<compile_context>
chip_gen: v5e
topology: v5e:2x2
jax: 0.10.0
libtpu: 0.0.40
codegen_flags: <defaults>
</compile_context>

<pallas_src>
import math

import jax
import jax.numpy as jnp
from jax.experimental import pallas as pl
from jax.experimental.pallas import tpu as pltpu


def _round_up(x, n):
    return ((x + n - 1) // n) * n


def _vmem_budget_bytes():
    """~80% of physical VMEM; leaves headroom for Mosaic-internal scratch."""
    cap = 64 << 20  # conservative default (v7x per-TensorCore VMEM)
    try:
        cap = int(pltpu.get_tpu_info().vmem_capacity_bytes)
    except Exception:
        pass
    return int(cap * 0.8)


def _tile_vmem_bytes(tm, tn, tk, isz_in, isz_out):
    # Double-buffered h / W_t / out pipeline tiles + bias tile (f32) + f32
    # accumulator scratch + slack for Mosaic internals.
    return (
        2 * (tm * tk + tk * tn) * isz_in
        + 2 * tm * tn * isz_out
        + 2 * tn * 4
        + tm * tn * 4
        + (2 << 20)
    )


def prepare_remi_head_params(weight, bias, *, compute_dtype=None, tm_max=256,
                             tn_max=2048, tk_max=4096):
    """One-time parameter prep: transpose W to [d_model, n_vocab], pad the
    vocab axis to whole lane-dense tiles, pick (tn, tk) to fit the VMEM
    budget of the current TPU generation. Call this at module-setup time."""
    n_vocab, d_model = weight.shape
    in_dtype = jnp.dtype(compute_dtype) if compute_dtype is not None else jnp.dtype(weight.dtype)
    isz_in = in_dtype.itemsize
    isz_out = jnp.dtype(weight.dtype).itemsize

    budget = _vmem_budget_bytes()

    n_pad128 = _round_up(n_vocab, 128)
    tn_cap = min(tn_max, n_pad128)
    tn_candidates = list(range(128, tn_cap + 1, 128))

    def pick_tn(tk_try):
        feas = [t for t in tn_candidates
                if _tile_vmem_bytes(tm_max, t, tk_try, isz_in, isz_out) <= budget]
        if not feas:
            return None
        # Minimize padded vocab size; tie-break toward the larger tile
        # (fewer h re-reads, larger lane-dense output stores).
        return min(feas, key=lambda t: (_round_up(n_vocab, t), -t))

    # Prefer full-K blocks: weight streamed from HBM exactly once overall.
    tk = d_model
    tn = pick_tn(tk)
    if tn is None:
        # K-tiling fallback for very large d_model on small-VMEM parts (v7x).
        tn = min(512, n_pad128)
        tk_cands = [t for t in range(128, min(d_model, tk_max) + 1, 128)
                    if _tile_vmem_bytes(tm_max, tn, t, isz_in, isz_out) <= budget]
        tk = max(tk_cands) if tk_cands else 128

    n_pad = _round_up(n_vocab, tn)
    k_pad = d_model if tk == d_model else _round_up(d_model, tk)

    w_t = weight.T  # [d_model, n_vocab] — one-time layout change at setup
    if compute_dtype is not None:
        w_t = w_t.astype(compute_dtype)
    if n_pad != n_vocab or k_pad != d_model:
        w_t = jnp.pad(w_t, ((0, k_pad - d_model), (0, n_pad - n_vocab)))
    b = bias.astype(jnp.float32)
    if n_pad != n_vocab:
        b = jnp.pad(b, ((0, n_pad - n_vocab),))
    b2d = b.reshape(1, n_pad)

    return dict(
        w_t=w_t, b=b2d, d_model=d_model, n_vocab=n_vocab,
        n_pad=n_pad, k_pad=k_pad, tn=tn, tk=tk, tm_max=tm_max,
        compute_dtype=compute_dtype, vmem_limit=budget,
    )


def _remi_head_kernel(h_ref, w_ref, b_ref, o_ref, acc_ref):
    # h_ref: (tm, tk)  activation tile
    # w_ref: (tk, tn)  pre-transposed weight tile (lane-dense on vocab)
    # b_ref: (1, tn)   f32 bias slice
    # o_ref: (tm, tn)  lane-dense output tile
    # acc_ref: (tm, tn) f32 accumulator (resident across the K axis)
    k = pl.program_id(2)

    @pl.when(k == 0)
    def _init():
        acc_ref[...] = jnp.zeros_like(acc_ref)

    acc_ref[...] += jnp.dot(h_ref[...], w_ref[...],
                            preferred_element_type=jnp.float32)

    @pl.when(k == pl.num_programs(2) - 1)
    def _finalize():
        o_ref[...] = (acc_ref[...] + b_ref[...]).astype(o_ref.dtype)


def remi_head_forward(h, params):
    """h: [..., d_model] -> logits [..., n_vocab]."""
    d_model = params["d_model"]
    n_vocab = params["n_vocab"]
    n_pad = params["n_pad"]
    k_pad = params["k_pad"]
    tn = params["tn"]
    tk = params["tk"]
    tm_max = params["tm_max"]
    w_t = params["w_t"]
    b2d = params["b"]
    compute_dtype = params["compute_dtype"]

    assert h.shape[-1] == d_model
    out_dtype = h.dtype
    lead = h.shape[:-1]
    m = math.prod(lead) if lead else 1

    h2d = h.reshape(m, d_model)
    if compute_dtype is not None and h2d.dtype != jnp.dtype(compute_dtype):
        h2d = h2d.astype(compute_dtype)

    # Row tile: exact padded-M for small / decode M, else the candidate with
    # the least padding waste.
    m_pad8 = _round_up(m, 8)
    if m_pad8 <= tm_max:
        tm = m_pad8
    else:
        tm = min((256, 128, 64), key=lambda t: (_round_up(m_pad8, t), -t))
    m_pad = _round_up(m_pad8, tm)

    if m_pad != m or k_pad != d_model:
        # TODO(synk): activation K-padding only triggers in the huge-d_model
        # K-tiling fallback; pick d_model / tk so this stays a no-op.
        h2d = jnp.pad(h2d, ((0, m_pad - m), (0, k_pad - d_model)))

    num_m = m_pad // tm
    num_n = n_pad // tn
    num_k = k_pad // tk

    isz_in = jnp.dtype(h2d.dtype).itemsize
    isz_out = jnp.dtype(out_dtype).itemsize
    h_bytes = m_pad * k_pad * isz_in * num_n                     # h re-read per vocab tile
    w_bytes = n_pad * k_pad * isz_in * (num_m if num_k > 1 else 1)
    o_bytes = m_pad * n_pad * isz_out
    cost = pl.CostEstimate(
        flops=2 * m_pad * k_pad * n_pad,
        transcendentals=0,
        bytes_accessed=h_bytes + w_bytes + o_bytes + n_pad * 4,
    )

    # Megacore: split the vocab axis (keeps total weight HBM traffic at N*K);
    # rows stay sequential unless there is only one vocab tile.
    m_sem = "parallel" if num_n == 1 else "arbitrary"
    dim_sem = ("parallel", m_sem, "arbitrary")

    out = pl.pallas_call(
        _remi_head_kernel,
        out_shape=jax.ShapeDtypeStruct((m_pad, n_pad), out_dtype),
        grid_spec=pltpu.PrefetchScalarGridSpec(
            num_scalar_prefetch=0,
            # vocab tiles outer, row tiles middle, K (reduction) innermost.
            grid=(num_n, num_m, num_k),
            in_specs=[
                pl.BlockSpec((tm, tk), lambda j, i, k: (i, k)),
                pl.BlockSpec((tk, tn), lambda j, i, k: (k, j)),
                pl.BlockSpec((1, tn), lambda j, i, k: (0, j)),
            ],
            out_specs=pl.BlockSpec((tm, tn), lambda j, i, k: (i, j)),
            scratch_shapes=[pltpu.VMEM((tm, tn), jnp.float32)],
        ),
        compiler_params=pltpu.CompilerParams(
            dimension_semantics=dim_sem,
            vmem_limit_bytes=int(params["vmem_limit"]),
        ),
        cost_estimate=cost,
    )(h2d, w_t, b2d)

    if m_pad != m or n_pad != n_vocab:
        out = out[:m, :n_vocab]
    return out.reshape(*lead, n_vocab)


if __name__ == "__main__":
    # Small config consistent with the module: d_model=32, n_vocab=64.
    config = {"d_model": 32, "n_vocab": 64}
    batch, seq = 2, 8

    key = jax.random.PRNGKey(0)
    k_h, k_w, k_b = jax.random.split(key, 3)

    # nn.Linear shapes: W [n_vocab, d_model], b [n_vocab].
    h = jax.random.normal(k_h, (batch, seq, config["d_model"]), dtype=jnp.float32)
    weight = jax.random.normal(
        k_w, (config["n_vocab"], config["d_model"]), dtype=jnp.float32
    ) * (1.0 / jnp.sqrt(config["d_model"]))
    bias = jax.random.normal(k_b, (config["n_vocab"],), dtype=jnp.float32) * 0.01

    # One-time parameter prep (transpose / pad / tile selection).  Pass
    # compute_dtype=jnp.bfloat16 for bf16 operands with f32 accumulation when
    # model accuracy allows (roughly doubles the achievable roofline).
    params = prepare_remi_head_params(weight, bias)

    y = jax.block_until_ready(remi_head_forward(h, params))

    # Reference check against plain JAX (same as torch nn.Linear forward).
    y_ref = h @ weight.T + bias
    assert y.shape == (batch, seq, config["n_vocab"])
    assert jnp.allclose(y, y_ref, atol=1e-5, rtol=1e-5)

    print("KERNEL_OK")
</pallas_src>

<mosaic_0001>
module attributes {stable_mosaic.version = 11 : i64} {
  func.func @_remi_head_kernel(%arg0: i32, %arg1: i32, %arg2: i32, %arg3: memref<16x32xf32, #tpu.memory_space<vmem>>, %arg4: memref<32x128xf32, #tpu.memory_space<vmem>>, %arg5: memref<1x128xf32, #tpu.memory_space<vmem>>, %arg6: memref<16x128xf32, #tpu.memory_space<vmem>>, %arg7: memref<16x128xf32, #tpu.memory_space<vmem>>) attributes {dimension_semantics = [#tpu.dimension_semantics<parallel>, #tpu.dimension_semantics<parallel>, #tpu.dimension_semantics<arbitrary>], iteration_bounds = array<i64: 1, 1, 1>, scalar_prefetch = 0 : i64, scratch_operands = 1 : i64, tpu.core_type = #tpu.core_type<tc>, window_params = [{transform_indices = @transform_0, window_bounds = array<i64: 16, 32>}, {transform_indices = @transform_1, window_bounds = array<i64: 32, 128>}, {transform_indices = @transform_2, window_bounds = array<i64: 1, 128>}, {transform_indices = @transform_3, window_bounds = array<i64: 16, 128>}]} {
    %c0_i32 = arith.constant 0 : i32
    %0 = arith.cmpi eq, %arg2, %c0_i32 : i32
    %1 = arith.extui %0 : i1 to i32
    %c0_i32_0 = arith.constant 0 : i32
    %2 = arith.cmpi ne, %1, %c0_i32_0 : i32
    scf.if %2 {
      %cst_10 = arith.constant 0.000000e+00 : f32
      %12 = vector.broadcast %cst_10 : f32 to vector<16x128xf32>
      %c0_11 = arith.constant 0 : index
      %c0_12 = arith.constant 0 : index
      %13 = vector.load %arg7[%c0_11, %c0_12] : memref<16x128xf32, #tpu.memory_space<vmem>>, vector<16x128xf32>
      tpu.vector_store %arg7[%c0_11, %c0_12], %12 {strides = array<i32>} : memref<16x128xf32, #tpu.memory_space<vmem>>, vector<16x128xf32>,
    } else {
    }
    %c0 = arith.constant 0 : index
    %c0_1 = arith.constant 0 : index
    %3 = vector.load %arg7[%c0, %c0_1] : memref<16x128xf32, #tpu.memory_space<vmem>>, vector<16x128xf32>
    %c0_2 = arith.constant 0 : index
    %c0_3 = arith.constant 0 : index
    %4 = vector.load %arg3[%c0_2, %c0_3] : memref<16x32xf32, #tpu.memory_space<vmem>>, vector<16x32xf32>
    %c0_4 = arith.constant 0 : index
    %c0_5 = arith.constant 0 : index
    %5 = vector.load %arg4[%c0_4, %c0_5] : memref<32x128xf32, #tpu.memory_space<vmem>>, vector<32x128xf32>
    %cst = arith.constant dense<0.000000e+00> : vector<16x128xf32>
    %6 = tpu.matmul %4, %5, %cst {dimension_numbers = #tpu.dot_dimension_numbers<[1], [0], [0], [1], [0, 0, 1, 1], [], []>} : vector<16x32xf32>, vector<32x128xf32>, vector<16x128xf32> -> vector<16x128xf32>
    %7 = arith.addf %3, %6 : vector<16x128xf32>
    %c0_6 = arith.constant 0 : index
    %c0_7 = arith.constant 0 : index
    %8 = vector.load %arg7[%c0_6, %c0_7] : memref<16x128xf32, #tpu.memory_space<vmem>>, vector<16x128xf32>
    tpu.vector_store %arg7[%c0_6, %c0_7], %7 {strides = array<i32>} : memref<16x128xf32, #tpu.memory_space<vmem>>, vector<16x128xf32>,
    %c0_i32_8 = arith.constant 0 : i32
    %9 = arith.cmpi eq, %arg2, %c0_i32_8 : i32
    %10 = arith.extui %9 : i1 to i32
    %c0_i32_9 = arith.constant 0 : i32
    %11 = arith.cmpi ne, %10, %c0_i32_9 : i32
    scf.if %11 {
      %c0_10 = arith.constant 0 : index
      %c0_11 = arith.constant 0 : index
      %12 = vector.load %arg7[%c0_10, %c0_11] : memref<16x128xf32, #tpu.memory_space<vmem>>, vector<16x128xf32>
      %c0_12 = arith.constant 0 : index
      %c0_13 = arith.constant 0 : index
      %13 = vector.load %arg5[%c0_12, %c0_13] : memref<1x128xf32, #tpu.memory_space<vmem>>, vector<1x128xf32>
      %14 = vector.broadcast %13 : vector<1x128xf32> to vector<16x128xf32>
      %15 = arith.addf %12, %14 : vector<16x128xf32>
      %c0_14 = arith.constant 0 : index
      %c0_15 = arith.constant 0 : index
      %16 = vector.load %arg6[%c0_14, %c0_15] : memref<16x128xf32, #tpu.memory_space<vmem>>, vector<16x128xf32>
      tpu.vector_store %arg6[%c0_14, %c0_15], %15 {strides = array<i32>} : memref<16x128xf32, #tpu.memory_space<vmem>>, vector<16x128xf32>,
    } else {
    }
    return
  }
  func.func @transform_0(%arg0: i32, %arg1: i32, %arg2: i32) -> (i32, i32) {
    %c0_i32 = arith.constant 0 : i32
    return %arg1, %arg2 : i32, i32
  }
  func.func @transform_1(%arg0: i32, %arg1: i32, %arg2: i32) -> (i32, i32) {
    %c0_i32 = arith.constant 0 : i32
    return %arg2, %arg0 : i32, i32
  }
  func.func @transform_2(%arg0: i32, %arg1: i32, %arg2: i32) -> (i32, i32) {
    %c0_i32 = arith.constant 0 : i32
    %c0_i32_0 = arith.constant 0 : i32
    return %c0_i32, %arg0 : i32, i32
  }
  func.func @transform_3(%arg0: i32, %arg1: i32, %arg2: i32) -> (i32, i32) {
    %c0_i32 = arith.constant 0 : i32
    return %arg1, %arg0 : i32, i32
  }
}

</mosaic_0001>

<bundles_post_ra>
// kernel: tpu_custom_call.1
= control target key start
LH: loop header
LB: loop body
LE: loop exit
PB: predicated region body
PF: predicated region fallthrough
CT: control target
= control target key end

     0   :  { %8 = vsyncpa [#allocation4], 0  ;;  %s264_s0 = inlined_call_operand.hbm [shape: f32[16,32], index: 0, kind: input, shape index: {}]   ;;  %s265_s1 = inlined_call_operand.hbm [shape: f32[32,128], index: 1, kind: input, shape index: {}]   ;;  %s266_s2 = inlined_call_operand.vmem [shape: f32[1,128], index: 2, kind: input, shape index: {}]   ;;  %s267_s3 = inlined_call_operand.hbm [shape: f32[16,128], index: 3, kind: output, shape index: {}]  }
   0x1   :  { %9 = vsyncpa [#allocation7], 0 }
   0x2   :  { %10 = vsyncpa [#allocation5], 0  ;;  %s15_s14 = sshll.u32 %s264_s0, 4  ;;  %s218_s15 = smov [#allocation3]   ;;  %s16_s14 = int_to_ptr.hbm [resolvable:$true] %s15_s14 }
   0x3   :  { %s17_s16 = sshll.u32 %s218_s15, 4  ;;  %s28_s19 = sshll.u32 %s265_s1, 4  ;;  %s18_s16 = int_to_ptr.vmem [resolvable:$true] %s17_s16  ;;  %s29_s19 = int_to_ptr.hbm [resolvable:$true] %s28_s19 }
   0x4   :  { %s219_s20 = smov 128   ;;  %s220_s21 = smov 8  }
   0x5   :  { %23 = dma.hbm_to_vmem [thread:$0]  %s16_s14, 256, %s18_s16, [#allocation4], %s219_s20, %s219_s20, %s220_s21  }
   0x6   :  { %s221_s22 = smov [#allocation6]  }
   0x7   :  { %s30_s23 = sshll.u32 %s221_s22, 4  ;;  %s31_s23 = int_to_ptr.vmem [resolvable:$true] %s30_s23 }
   0x8   :  { %36 = dma.hbm_to_vmem [thread:$0]  %s29_s19, 512, %s31_s23, [#allocation7], %s219_s20, %s219_s20, %s220_s21  }
   0x9   :  { %212 = dma.done.wait [#allocation4], 256  }
   0xa   :  { %213 = vsyncadd [#allocation4], 4294967040 }
   0xb   :  { %214 = dma.done.wait [#allocation7], 512  }
   0xc   :  { %215 = vsyncadd [#allocation7], 4294966784  ;;  %v60_v0 = vld [vmem:[#allocation6 + $0x18] sm:$0xff]  ;;  %v59_v1 = vld [vmem:[#allocation6 + $0x10] sm:$0xff]  ;;  %vm61_vm0 = vcmask 261120   ;;  %s222_s24 = smov [#allocation8]  }
   0xd   :  { %80 = vmatpush.msra.mxu0 %v60_v0  ;;  %130 = vmatpush.msra.mxu1 %v60_v0  ;;  %v58_v2 = vld [vmem:[#allocation6 + $0x8] sm:$0xff]  ;;  %v57_v3 = vld [vmem:[#allocation6] sm:$0xff]  ;;  %v55_v4 = vld [vmem:[#allocation3] sm:$0xff]  ;;  %s112_s25 = sshll.u32 %s222_s24, 4  ;;  %s114_s28 = sshll.u32 %s267_s3, 4  ;;  %s113_s25 = int_to_ptr.vmem [resolvable:$true] %s112_s25  ;;  %s115_s28 = int_to_ptr.hbm [resolvable:$true] %s114_s28 }
   0xe   :  { %v56_v5 = vld [vmem:[#allocation3 + $0x8] sm:$0xff]  ;;  %v139_v6 = vld [vmem:[%s266_s2] ss:$0 sm:$0xff] }
   0xf   :  { %81 = vmatpush.msra.mxu0 %v59_v1  ;;  %131 = vmatpush.msra.mxu1 %v59_v1 }
  0x11   :  { %82 = vmatpush.msra.mxu0 %v58_v2  ;;  %132 = vmatpush.msra.mxu1 %v58_v2 }
  0x13   :  { %83 = vmatpush.msra.mxu0 %v57_v3  ;;  %133 = vmatpush.msra.mxu1 %v57_v3 }
  0x14   :  { %128 = vmatmul.msk.f32.vlgmr.msra.gmra.mxu0 %vm61_vm0, %v55_v4  ;;  %129 = vmatmul.msk.f32.vlgmr.msra.gmra.mxu1 %vm61_vm0, %v56_v5 }
  0x91   :  { %v85_v7 = vpop.f32.mrf.mxu0  ;;  %v88_v8 = vpop.f32.mrf.mxu1 }
  0x92   :  { %v104_v9 = vadd.f32 %v139_v6, %v85_v7  ;;  %v105_v10 = vadd.f32 %v139_v6, %v88_v8 }
  0x94   :  { %106 = vst [vmem:[#allocation8] sm:$0xff] %v104_v9 }
  0x95   :  { %107 = vst [vmem:[#allocation8 + $0x8] sm:$0xff] %v105_v10 }
  0x96   :  { %120 = dma.vmem_to_hbm [thread:$0]  %s113_s25, 256, %s115_s28, [#allocation5], %s219_s20, %s219_s20, %s220_s21  }
  0x97   :  { %216 = dma.done.wait [#allocation5], 256  }
  0x98   :  { %217 = vsyncadd [#allocation5], 4294967040 }
  0x99   :  { %125 = vsyncpa [#allocation4], 1 }
  0x9a   :  { %126 = vsyncpa [#allocation7], 1 }
  0x9b   :  { %127 = vsyncpa [#allocation5], 1 }

</bundles_post_ra>
